<compile_context>
chip_gen: v7x
topology: tpu7x:2x2x1
jax: 0.10.0
libtpu: 0.0.40
codegen_flags: <defaults>
</compile_context>

<pallas_src>
import functools

import jax
import jax.numpy as jnp
from jax.experimental import pallas as pl
from jax.experimental.pallas import tpu as pltpu


_LN_ROW_TILE = 1024      # LN-only path: big tiles amortize per-step overhead
_FUSED_ROW_TILE = 512    # fused path: weight / scratch also live in VMEM


def _round_up(n, m):
    return ((n + m - 1) // m) * m


def _cdiv(a, b):
    return (a + b - 1) // b


def _vmem_budget_bytes():
    """Generation-aware VMEM budget: 3/4 of physical (96 MiB v5e/v6e, 48 MiB v7x)."""
    cap = 64 * 1024 * 1024
    try:
        info = pltpu.get_tpu_info()
        cap = int(getattr(info, "vmem_capacity_bytes", cap))
    except Exception:
        pass
    return max(32 * 1024 * 1024, (cap // 4) * 3)


def _pick_row_tile(rows, feat, budget, target):
    if rows <= 8:
        return rows
    # Prefer >= 2 row blocks so both v7x TensorCores get work under
    # dimension_semantics=("parallel", ...).
    tm = max(8, min(target, _round_up(_cdiv(rows, 2), 8)))
    budget = max(budget, 2 * 1024 * 1024)
    # Keep the per-step working set (double-buffered f32 in/out + scratch)
    # comfortably inside the budget.
    while tm > 8 and 12 * tm * feat * 4 > budget:
        tm = max(8, _round_up(tm // 2, 8))
    return tm


def _compiler_params(sem, vmem_limit):
    return pltpu.CompilerParams(
        dimension_semantics=sem,
        vmem_limit_bytes=int(vmem_limit),
    )


# ---------------------------------------------------------------------------
# Kernels
# ---------------------------------------------------------------------------
def _layernorm_stats(x, eps, feat):
    """x: (tm, D) f32 -> (x - mean, 1/(std_unbiased + eps))."""
    mean = jnp.sum(x, axis=-1, keepdims=True) * (1.0 / feat)
    xc = x - mean
    # torch.std(-1) is unbiased: divide by (N - 1) via constant multiply.
    var_unb = jnp.sum(xc * xc, axis=-1, keepdims=True) * (1.0 / (feat - 1))
    # approx=True -> EUP vrcp on an otherwise idle slot.
    inv = pl.reciprocal(jnp.sqrt(var_unb) + eps, approx=True)
    return xc, inv


def layernorm_kernel(x_ref, g_ref, b_ref, o_ref, *, eps, feat):
    x = x_ref[...].astype(jnp.float32)                       # (tm, D)
    xc, inv = _layernorm_stats(x, eps, feat)
    g = g_ref[...].astype(jnp.float32)
    b = b_ref[...].astype(jnp.float32)
    o_ref[...] = (xc * inv * g + b).astype(o_ref.dtype)


def fused_resident_kernel(x_ref, g_ref, b_ref, w_ref, o_ref, *, eps, feat):
    # LayerNorm -> bf16 MXU matmul (full resident weight) -> residual add,
    # one pass over the row tile: normed / sub_out never touch HBM.
    x = x_ref[...].astype(jnp.float32)                       # (tm, D)
    xc, inv = _layernorm_stats(x, eps, feat)
    g = g_ref[...].astype(jnp.float32)
    b = b_ref[...].astype(jnp.float32)
    normed = (xc * inv * g + b).astype(jnp.bfloat16)         # bf16 feed to MXU
    sub = jnp.dot(normed, w_ref[...],                        # w_ref already bf16
                  preferred_element_type=jnp.float32)        # f32 accumulation
    # dropout in eval mode == identity; residual add in f32.
    o_ref[...] = (x + sub).astype(o_ref.dtype)


def fused_ntiled_kernel(x_ref, xres_ref, g_ref, b_ref, w_ref, o_ref,
                        normed_ref, *, eps, feat):
    # Weight streamed in (D, tn) column tiles along the inner grid axis.
    # LayerNorm is computed once per row tile and cached in a bf16 scratch.
    @pl.when(pl.program_id(1) == 0)
    def _():
        x = x_ref[...].astype(jnp.float32)                   # (tm, D)
        xc, inv = _layernorm_stats(x, eps, feat)
        g = g_ref[...].astype(jnp.float32)
        b = b_ref[...].astype(jnp.float32)
        normed_ref[...] = (xc * inv * g + b).astype(normed_ref.dtype)

    sub = jnp.dot(normed_ref[...], w_ref[...],               # bf16 x bf16 on MXU
                  preferred_element_type=jnp.float32)        # (tm, tn)
    o_ref[...] = (xres_ref[...].astype(jnp.float32) + sub).astype(o_ref.dtype)


# ---------------------------------------------------------------------------
# pallas_call wrappers (row-tiled, ragged final block, pipelined)
# ---------------------------------------------------------------------------
def _layernorm_pallas(x2d, gamma, beta, *, eps, tm, vmem_limit):
    rows, feat = x2d.shape
    nblk = _cdiv(rows, tm)
    g2d = gamma.reshape(1, feat)
    b2d = beta.reshape(1, feat)
    return pl.pallas_call(
        functools.partial(layernorm_kernel, eps=eps, feat=feat),
        out_shape=jax.ShapeDtypeStruct((rows, feat), x2d.dtype),
        grid_spec=pltpu.PrefetchScalarGridSpec(
            num_scalar_prefetch=0,
            grid=(nblk,),
            in_specs=[
                pl.BlockSpec((tm, feat), lambda i: (i, 0)),                    # x
                pl.BlockSpec((1, feat), lambda i: (0, 0),
                             pipeline_mode=pl.Buffered(1)),                    # gamma
                pl.BlockSpec((1, feat), lambda i: (0, 0),
                             pipeline_mode=pl.Buffered(1)),                    # beta
            ],
            out_specs=pl.BlockSpec((tm, feat), lambda i: (i, 0)),
        ),
        compiler_params=_compiler_params(("parallel",), vmem_limit),
        cost_estimate=pl.CostEstimate(
            flops=8 * rows * feat,
            transcendentals=2 * rows,
            bytes_accessed=2 * rows * feat * x2d.dtype.itemsize),
    )(x2d, g2d, b2d)


def _fused_resident_pallas(x2d, w_bf16, gamma, beta, *, eps, tm, vmem_limit):
    rows, feat = x2d.shape
    nblk = _cdiv(rows, tm)
    g2d = gamma.reshape(1, feat)
    b2d = beta.reshape(1, feat)
    return pl.pallas_call(
        functools.partial(fused_resident_kernel, eps=eps, feat=feat),
        out_shape=jax.ShapeDtypeStruct((rows, feat), x2d.dtype),
        grid_spec=pltpu.PrefetchScalarGridSpec(
            num_scalar_prefetch=0,
            grid=(nblk,),
            in_specs=[
                pl.BlockSpec((tm, feat), lambda i: (i, 0)),                    # x
                pl.BlockSpec((1, feat), lambda i: (0, 0),
                             pipeline_mode=pl.Buffered(1)),                    # gamma
                pl.BlockSpec((1, feat), lambda i: (0, 0),
                             pipeline_mode=pl.Buffered(1)),                    # beta
                pl.BlockSpec((feat, feat), lambda i: (0, 0),
                             pipeline_mode=pl.Buffered(1)),                    # w (resident)
            ],
            out_specs=pl.BlockSpec((tm, feat), lambda i: (i, 0)),
        ),
        compiler_params=_compiler_params(("parallel",), vmem_limit),
        cost_estimate=pl.CostEstimate(
            flops=2 * rows * feat * feat,
            transcendentals=2 * rows,
            bytes_accessed=2 * rows * feat * 4 + feat * feat * 2),
    )(x2d, g2d, b2d, w_bf16)


def _fused_ntiled_pallas(x2d, w_bf16, gamma, beta, *, eps, tm, tn, vmem_limit):
    rows, feat = x2d.shape
    nblk_m = _cdiv(rows, tm)
    nblk_n = feat // tn
    g2d = gamma.reshape(1, feat)
    b2d = beta.reshape(1, feat)
    return pl.pallas_call(
        functools.partial(fused_ntiled_kernel, eps=eps, feat=feat),
        out_shape=jax.ShapeDtypeStruct((rows, feat), x2d.dtype),
        grid_spec=pltpu.PrefetchScalarGridSpec(
            num_scalar_prefetch=0,
            grid=(nblk_m, nblk_n),
            in_specs=[
                pl.BlockSpec((tm, feat), lambda i, j: (i, 0)),                 # x (LN source)
                pl.BlockSpec((tm, tn), lambda i, j: (i, j)),                   # x (residual cols)
                pl.BlockSpec((1, feat), lambda i, j: (0, 0),
                             pipeline_mode=pl.Buffered(1)),                    # gamma
                pl.BlockSpec((1, feat), lambda i, j: (0, 0),
                             pipeline_mode=pl.Buffered(1)),                    # beta
                pl.BlockSpec((feat, tn), lambda i, j: (0, j)),                 # w column tile
            ],
            out_specs=pl.BlockSpec((tm, tn), lambda i, j: (i, j)),
            scratch_shapes=[pltpu.VMEM((tm, feat), jnp.bfloat16)],             # cached normed
        ),
        compiler_params=_compiler_params(("parallel", "arbitrary"), vmem_limit),
        cost_estimate=pl.CostEstimate(
            flops=2 * rows * feat * feat,
            transcendentals=2 * rows,
            bytes_accessed=3 * rows * feat * 4 + feat * feat * 2),
    )(x2d, x2d, g2d, b2d, w_bf16)


# ---------------------------------------------------------------------------
# Public API
# ---------------------------------------------------------------------------
def sublayer_connection(x, sublayer, gamma, beta, *, eps=1e-6, row_tile=None):
    """General path: Pallas LayerNorm kernel + arbitrary sublayer callable.

    The residual add is left to XLA so it fuses into the sublayer's epilogue.
    Dropout is eval-mode identity.
    """
    B, S, D = x.shape
    assert D >= 2, "unbiased std needs >= 2 features (torch gives NaN for 1)"
    rows = B * S
    budget = _vmem_budget_bytes()
    tm = _pick_row_tile(rows, D, budget, row_tile or _LN_ROW_TILE)
    x2d = x.reshape(rows, D)
    normed = _layernorm_pallas(x2d, gamma, beta, eps=eps, tm=tm, vmem_limit=budget)
    sub_out = sublayer(normed.reshape(B, S, D))
    return x + sub_out


def sublayer_connection_fused_linear(x, w, gamma, beta, *, eps=1e-6,
                                     n_tile=None, row_tile=None):
    """Fully fused path when the sublayer is a (D, D) linear map:
    LayerNorm -> bf16 MXU matmul -> residual add in one kernel per row tile.
    For large D the weight is streamed in (D, n_tile) column tiles."""
    B, S, D = x.shape
    assert w.shape == (D, D)
    assert D >= 2, "unbiased std needs >= 2 features (torch gives NaN for 1)"
    rows = B * S
    budget = _vmem_budget_bytes()
    w_bf16 = w.astype(jnp.bfloat16)           # MXU is bf16-native on v5e/v6e/v7x
    x2d = x.reshape(rows, D)

    if n_tile is None:
        # Keep the full (D, D) bf16 weight VMEM-resident unless it would eat a
        # big chunk of the budget (the v7x 64 MiB cliff), then stream columns.
        if 2 * D * D <= budget // 4 or D % 128 != 0:
            n_tile = D
        else:
            n_tile = 512 if D % 512 == 0 else 128
    n_tile = min(n_tile, D)
    if n_tile != D:
        assert D % n_tile == 0 and n_tile % 128 == 0, \
            "n_tile must divide D and be a multiple of 128"

    target = row_tile or _FUSED_ROW_TILE
    if n_tile == D:
        tm = _pick_row_tile(rows, D, budget - 2 * D * D, target)
        out2d = _fused_resident_pallas(x2d, w_bf16, gamma, beta, eps=eps, tm=tm,
                                       vmem_limit=budget)
    else:
        tm = _pick_row_tile(rows, D, budget - 4 * D * n_tile, target)
        out2d = _fused_ntiled_pallas(x2d, w_bf16, gamma, beta, eps=eps, tm=tm,
                                     tn=n_tile, vmem_limit=budget)
    return out2d.reshape(B, S, D)


# ---------------------------------------------------------------------------
# Reference (pure JAX, f32) for a sanity check.
# ---------------------------------------------------------------------------
def _reference(x, sublayer, gamma, beta, eps=1e-6):
    mean = jnp.mean(x, axis=-1, keepdims=True)
    xc = x - mean
    var_unb = jnp.sum(xc * xc, axis=-1, keepdims=True) / (x.shape[-1] - 1)
    std = jnp.sqrt(var_unb)
    normed = gamma * xc / (std + eps) + beta
    return x + sublayer(normed)


if __name__ == "__main__":
    key = jax.random.PRNGKey(0)
    k_x, k_w, k_x2, k_w2, k_x3, k_w3 = jax.random.split(key, 6)

    # Tolerances: general path deviates only via the approx EUP reciprocal in
    # LN; fused path additionally rounds matmul operands to bf16 (f32 accum).
    GEN_TOL = dict(atol=2e-2, rtol=2e-2)
    FUSED_TOL = dict(atol=5e-2, rtol=5e-2)

    # ---- small shape matching the module's toy usage -----------------------
    B, S, D = 2, 8, 32
    x = jax.random.normal(k_x, (B, S, D), dtype=jnp.float32)
    gamma = jnp.ones((D,), dtype=jnp.float32)   # LayerNorm a_2
    beta = jnp.zeros((D,), dtype=jnp.float32)   # LayerNorm b_2
    w = jax.random.normal(k_w, (D, D), dtype=jnp.float32) * 0.1

    def sublayer(h):
        return jnp.einsum("bsd,de->bse", h, w)

    ref = _reference(x, sublayer, gamma, beta)

    out_fused = jax.block_until_ready(
        sublayer_connection_fused_linear(x, w, gamma, beta))
    assert out_fused.shape == (B, S, D)
    assert jnp.allclose(out_fused, ref, **FUSED_TOL), "fused mismatch"

    out_gen = jax.block_until_ready(sublayer_connection(x, sublayer, gamma, beta))
    assert jnp.allclose(out_gen, ref, **GEN_TOL), "general mismatch"

    # ---- larger, ragged shape to exercise ragged row blocks ----------------
    B2, S2, D2 = 4, 300, 128            # rows = 1200 -> 512-row tiles, ragged tail
    x2 = jax.random.normal(k_x2, (B2, S2, D2), dtype=jnp.float32)
    gamma2 = jnp.ones((D2,), dtype=jnp.float32)
    beta2 = jnp.zeros((D2,), dtype=jnp.float32)
    w2 = jax.random.normal(k_w2, (D2, D2), dtype=jnp.float32) * 0.05

    def sublayer2(h):
        return jnp.einsum("bsd,de->bse", h, w2)

    ref2 = _reference(x2, sublayer2, gamma2, beta2)

    out2_fused = jax.block_until_ready(
        sublayer_connection_fused_linear(x2, w2, gamma2, beta2))
    assert out2_fused.shape == (B2, S2, D2)
    assert jnp.allclose(out2_fused, ref2, **FUSED_TOL), "fused(big) mismatch"

    out2_gen = jax.block_until_ready(
        sublayer_connection(x2, sublayer2, gamma2, beta2))
    assert jnp.allclose(out2_gen, ref2, **GEN_TOL), "general(big) mismatch"

    # ---- force the N-tiled (streamed-weight) fused path --------------------
    B3, S3, D3 = 2, 64, 256             # n_tile=128 -> 2 weight column tiles
    x3 = jax.random.normal(k_x3, (B3, S3, D3), dtype=jnp.float32)
    gamma3 = jnp.ones((D3,), dtype=jnp.float32)
    beta3 = jnp.zeros((D3,), dtype=jnp.float32)
    w3 = jax.random.normal(k_w3, (D3, D3), dtype=jnp.float32) * 0.03

    def sublayer3(h):
        return jnp.einsum("bsd,de->bse", h, w3)

    ref3 = _reference(x3, sublayer3, gamma3, beta3)
    out3_fused = jax.block_until_ready(
        sublayer_connection_fused_linear(x3, w3, gamma3, beta3, n_tile=128))
    assert out3_fused.shape == (B3, S3, D3)
    assert jnp.allclose(out3_fused, ref3, **FUSED_TOL), "fused(ntiled) mismatch"

    print("KERNEL_OK")
</pallas_src>

<mosaic_0001>
module attributes {stable_mosaic.version = 11 : i64} {
  func.func @fused_resident_kernel(%arg0: i32, %arg1: memref<8x32xf32, #tpu.memory_space<vmem>>, %arg2: memref<1x32xf32, #tpu.memory_space<vmem>>, %arg3: memref<1x32xf32, #tpu.memory_space<vmem>>, %arg4: memref<32x32xbf16, #tpu.memory_space<vmem>>, %arg5: memref<8x32xf32, #tpu.memory_space<vmem>>) attributes {dimension_semantics = [#tpu.dimension_semantics<parallel>], iteration_bounds = array<i64: 2>, scalar_prefetch = 0 : i64, scratch_operands = 0 : i64, tpu.core_type = #tpu.core_type<tc>, window_params = [{transform_indices = @transform_0, window_bounds = array<i64: 8, 32>}, {pipeline_mode = #tpu.pipeline_mode<synchronous>, transform_indices = @transform_1, window_bounds = array<i64: 1, 32>}, {pipeline_mode = #tpu.pipeline_mode<synchronous>, transform_indices = @transform_2, window_bounds = array<i64: 1, 32>}, {pipeline_mode = #tpu.pipeline_mode<synchronous>, transform_indices = @transform_3, window_bounds = array<i64: 32, 32>}, {transform_indices = @transform_4, window_bounds = array<i64: 8, 32>}]} {
    %c0 = arith.constant 0 : index
    %c0_0 = arith.constant 0 : index
    %0 = vector.load %arg1[%c0, %c0_0] : memref<8x32xf32, #tpu.memory_space<vmem>>, vector<8x32xf32>
    %cst = arith.constant dense<0.000000e+00> : vector<8xf32>
    %1 = vector.multi_reduction <add>, %0, %cst [1] : vector<8x32xf32> to vector<8xf32>
    %2 = vector.shape_cast %1 : vector<8xf32> to vector<8x1xf32>
    %cst_1 = arith.constant 3.125000e-02 : f32
    %3 = vector.broadcast %cst_1 : f32 to vector<8x1xf32>
    %4 = arith.mulf %2, %3 : vector<8x1xf32>
    %5 = vector.broadcast %4 : vector<8x1xf32> to vector<8x32xf32>
    %6 = arith.subf %0, %5 : vector<8x32xf32>
    %7 = arith.mulf %6, %6 : vector<8x32xf32>
    %cst_2 = arith.constant dense<0.000000e+00> : vector<8xf32>
    %8 = vector.multi_reduction <add>, %7, %cst_2 [1] : vector<8x32xf32> to vector<8xf32>
    %9 = vector.shape_cast %8 : vector<8xf32> to vector<8x1xf32>
    %cst_3 = arith.constant 0.0322580636 : f32
    %10 = vector.broadcast %cst_3 : f32 to vector<8x1xf32>
    %11 = arith.mulf %9, %10 : vector<8x1xf32>
    %12 = math.sqrt %11 : vector<8x1xf32>
    %cst_4 = arith.constant 9.99999997E-7 : f32
    %13 = vector.broadcast %cst_4 : f32 to vector<8x1xf32>
    %14 = arith.addf %12, %13 : vector<8x1xf32>
    %15 = tpu.reciprocal %14 {approx = true} : vector<8x1xf32> -> vector<8x1xf32>
    %c0_5 = arith.constant 0 : index
    %c0_6 = arith.constant 0 : index
    %16 = vector.load %arg2[%c0_5, %c0_6] : memref<1x32xf32, #tpu.memory_space<vmem>>, vector<1x32xf32>
    %c0_7 = arith.constant 0 : index
    %c0_8 = arith.constant 0 : index
    %17 = vector.load %arg3[%c0_7, %c0_8] : memref<1x32xf32, #tpu.memory_space<vmem>>, vector<1x32xf32>
    %18 = vector.broadcast %15 : vector<8x1xf32> to vector<8x32xf32>
    %19 = arith.mulf %6, %18 : vector<8x32xf32>
    %20 = vector.broadcast %16 : vector<1x32xf32> to vector<8x32xf32>
    %21 = arith.mulf %19, %20 : vector<8x32xf32>
    %22 = vector.broadcast %17 : vector<1x32xf32> to vector<8x32xf32>
    %23 = arith.addf %21, %22 : vector<8x32xf32>
    %24 = arith.truncf %23 : vector<8x32xf32> to vector<8x32xbf16>
    %c0_9 = arith.constant 0 : index
    %c0_10 = arith.constant 0 : index
    %25 = vector.load %arg4[%c0_9, %c0_10] : memref<32x32xbf16, #tpu.memory_space<vmem>>, vector<32x32xbf16>
    %cst_11 = arith.constant dense<0.000000e+00> : vector<8x32xf32>
    %26 = tpu.matmul %24, %25, %cst_11 {dimension_numbers = #tpu.dot_dimension_numbers<[1], [0], [0], [1], [0, 0, 1, 1], [], []>} : vector<8x32xbf16>, vector<32x32xbf16>, vector<8x32xf32> -> vector<8x32xf32>
    %27 = arith.addf %0, %26 : vector<8x32xf32>
    %c0_12 = arith.constant 0 : index
    %c0_13 = arith.constant 0 : index
    %28 = vector.load %arg5[%c0_12, %c0_13] : memref<8x32xf32, #tpu.memory_space<vmem>>, vector<8x32xf32>
    tpu.vector_store %arg5[%c0_12, %c0_13], %27 {strides = array<i32>} : memref<8x32xf32, #tpu.memory_space<vmem>>, vector<8x32xf32>,
    return
  }
  func.func @transform_0(%arg0: i32) -> (i32, i32) {
    %c0_i32 = arith.constant 0 : i32
    %c0_i32_0 = arith.constant 0 : i32
    return %arg0, %c0_i32 : i32, i32
  }
  func.func @transform_1(%arg0: i32) -> (i32, i32) {
    %c0_i32 = arith.constant 0 : i32
    %c0_i32_0 = arith.constant 0 : i32
    %c0_i32_1 = arith.constant 0 : i32
    return %c0_i32, %c0_i32_0 : i32, i32
  }
  func.func @transform_2(%arg0: i32) -> (i32, i32) {
    %c0_i32 = arith.constant 0 : i32
    %c0_i32_0 = arith.constant 0 : i32
    %c0_i32_1 = arith.constant 0 : i32
    return %c0_i32, %c0_i32_0 : i32, i32
  }
  func.func @transform_3(%arg0: i32) -> (i32, i32) {
    %c0_i32 = arith.constant 0 : i32
    %c0_i32_0 = arith.constant 0 : i32
    %c0_i32_1 = arith.constant 0 : i32
    return %c0_i32, %c0_i32_0 : i32, i32
  }
  func.func @transform_4(%arg0: i32) -> (i32, i32) {
    %c0_i32 = arith.constant 0 : i32
    %c0_i32_0 = arith.constant 0 : i32
    return %arg0, %c0_i32 : i32, i32
  }
}

</mosaic_0001>

<bundles_post_ra>
// kernel: tpu_custom_call.1
= control target key start
LH: loop header
LB: loop body
LE: loop exit
PB: predicated region body
PF: predicated region fallthrough
CT: control target
= control target key end

     0   :  { %9 = vsyncpa [#allocation3], 0  ;;  %s892_s0 = inlined_call_operand.hbm [shape: f32[16,32], index: 0, kind: input, shape index: {}]   ;;  %s893_s1 = inlined_call_operand.vmem [shape: f32[1,32], index: 1, kind: input, shape index: {}]   ;;  %s894_s2 = inlined_call_operand.vmem [shape: f32[1,32], index: 2, kind: input, shape index: {}]   ;;  %s895_s3 = inlined_call_operand.hbm [shape: bf16[32,32], index: 3, kind: input, shape index: {}]   ;;  %s896_s4 = inlined_call_operand.hbm [shape: f32[16,32], index: 4, kind: output, shape index: {}]  }
   0x1   :  { %11 = vsyncpa [#allocation3 + $0x1], 0 }
   0x2   :  { %12 = vsyncpa [#allocation6], 0 }
   0x3   :  { %13 = vsyncpa [#allocation4], 0 }
   0x4   :  { %15 = vsyncpa [#allocation4 + $0x1], 0  ;;  %s682_s15 = smov 0   ;;  %s684_s16 = smov 0  }
   0x5   :  { %s686_s17 = smov 0   ;;  %s688_s18 = smov 0  }
   0x6 LB: > { %s703_s19 = sadd.s32 4294967295, %s648_s18   ;;  %s423_s20 = sadd.s32 4294967294, %s648_s18   ;;  %s648_s18 = sphi %s688_s18, %s916_s18   ;;  %s644_s17 = sphi %s686_s17, %s915_s17   ;;  %s640_s16 = sphi %s684_s16, %s914_s16   ;;  %s636_s15 = sphi %s682_s15, %s913_s15  }
   0x7   : > { %p41_p0 = scmp.ne.s32.totalorder %s640_s16, %s636_s15  ;;  %p897_p1 = scmp.eq.s32.totalorder %s703_s19, 0 }
   0x8   : > { %p134_p3 = scmp.eq.s32.totalorder %s423_s20, 1  ;;  %p424_p5 = scmp.ge.s32.totalorder %s648_s18, 1 }
   0x9   : > { %p712_p4 = por %p897_p1, %p41_p0  ;;  %p141_p7 = scmp.lt.s32.totalorder %s648_s18, 3 }
   0xa   : > { %p717_p6 = por %p134_p3, %p41_p0  ;;  %s650_s24 = smov [#allocation5]  }
   0xb   : > { %s900_s21 = scalar_select %p712_p4, 1, 0 }
   0xc   : > { %s901_s22 = scalar_select %p717_p6, 1, 0 }
   0xd   : > { %p722_p8 = pnand %p424_p5, %p141_p7  ;;  %s159_s25 = sshll.u32 %s650_s24, 4  ;;  %s726_s25 = int_to_ptr.vmem [resolvable:$true] %s159_s25 }
   0xe   : > { %s738_s27 = sadd.s32 1, %s648_s18   ;;  %s28_s28 = sadd.s32 1, %s644_s17 }
   0xf   : > { %s902_s23 = scalar_select %p722_p8, 1, 0 }
  0x10   : > { %p461_p9 = pneg %p722_p8  ;;  %s25_s29 = ssub.s32 %s648_s18, %s738_s27 }
  0x11   : > { %s520_s6 = scalar_lea.hbm %s895_s3, 256 }
  0x12   : > { %p733_p11 = pnand %p461_p9, %p897_p1  ;;  %p521_p12 = scmp.ne.s32.totalorder %s895_s3, %s520_s6 }
  0x13   : > { %p527_p5 = scmp.lt.u32.totalorder %s520_s6, %s895_s3 }
  0x14   : > { %p522_p13 = pneg %p733_p11 }
  0x16   : > { %p523_p0 = pnand %p522_p13, %p521_p12 }
  0x18   : > { %p524_p3 = pneg %p523_p0 }
  0x1a   : > { %p529_p7 = pnand %p527_p5, %p524_p3 }
  0x1c   : > { %532 = shalt.err (!%p529_p7)
}
  0x1d   : > { %s533_s11 = scalar_lea.vmem %s726_s25, 256  ;;  %p541_p2 = scmp.lt.s32.totalorder %s726_s25, %s726_s25 }
  0x1e   : > { %p534_p9 = scmp.ne.s32.totalorder %s726_s25, %s533_s11  ;;  %p542_p6 = scmp.lt.s32.totalorder %s533_s11, %s533_s11 }
  0x20   : > { %p536_p10 = pnand %p534_p9, %p522_p13  ;;  %p543_p4 = por %p542_p6, %p541_p2 }
  0x22   : > { %p537_p1 = pneg %p536_p10 }
  0x24   : > { %p544_p8 = pnand %p543_p4, %p537_p1 }
  0x26   : > { %547 = shalt.err (!%p544_p8)
}
  0x27   : > { %s651_s12 = smov 64   ;;  %s652_s13 = smov 4  }
  0x28   : > { %464 = dma.hbm_to_vmem [thread:$0]  (!%p733_p11), %s895_s3, 256, %s726_s25, [#allocation6], %s651_s12, %s651_s12, %s652_s13  }
  0x29   : > { %p26_p2 = scmp.eq.s32.totalorder %s25_s29, 0  ;;  %p35_p1 = scmp.ne.s32.totalorder %s644_s17, %s640_s16 }
  0x2a   : > { %p36_p4 = scmp.eq.s32.totalorder %s648_s18, 0  ;;  %p474_p6 = scmp.lt.s32.totalorder %s648_s18, 2 }
  0x2b   : > { %s769_s24 = scalar_select %p26_p2, %s644_s17, %s28_s28  }
  0x2c   : > { %p37_p8 = por %p36_p4, %p35_p1  ;;  %p904_p10 = scmp.eq.s32.totalorder %s703_s19, 1 }
  0x2d   : > { %s173_s5 = sand.u32 1, %s644_s17   ;;  %s428_s6 = sshll.u32 %s648_s18, 7 }
  0x2e   : > { %p773_p12 = por %p904_p10, %p35_p1  ;;  %s427_s7 = sshll.u32 %s173_s5, 3 }
  0x2f   : > { %s782_s9 = scalar_lea.hbm %s892_s0, %s428_s6  ;;  %s177_s25 = scalar_lea.vmem [#allocation2], %s427_s7 }
  0x30   : > { %s184_s28 = sshll.u32 %s177_s25, 4  ;;  %p784_p11 = pnand %p474_p6, %p37_p8  ;;  %s788_s28 = int_to_ptr.vmem [resolvable:$true] %s184_s28 }
  0x31   : > { %s174_s10 = scalar_lea.sflag [#allocation3], %s173_s5  ;;  %s548_s11 = scalar_lea.hbm %s782_s9, 128 }
  0x32   : > { %p549_p13 = scmp.ne.s32.totalorder %s782_s9, %s548_s11  ;;  %p550_p0 = pneg %p784_p11 }
  0x33   : > { %s553_s14 = scalar_lea.hbm %s892_s0, 256  ;;  %p554_p7 = scmp.lt.u32.totalorder %s782_s9, %s892_s0 }
  0x34   : > { %p551_p3 = pnand %p550_p0, %p549_p13  ;;  %p555_p9 = scmp.lt.u32.totalorder %s553_s14, %s548_s11 }
  0x35   : > { %p557_p1 = scmp.lt.u32.totalorder %s548_s11, %s782_s9 }
  0x36   : > { %p552_p5 = pneg %p551_p3  ;;  %p556_p2 = por %p555_p9, %p554_p7 }
  0x38   : > { %p558_p4 = por %p557_p1, %p556_p2 }
  0x3a   : > { %p559_p6 = pnand %p558_p4, %p552_p5 }
  0x3c   : > { %562 = shalt.err (!%p559_p6)
}
  0x3d   : > { %s563_s5 = scalar_lea.vmem %s788_s28, 128  ;;  %s653_s7 = smov [#allocation2]  }
  0x3e   : > { %p564_p8 = scmp.ne.s32.totalorder %s788_s28, %s563_s5  ;;  %s568_s26 = sshll.u32 %s653_s7, 4  ;;  %s569_s26 = int_to_ptr.vmem [resolvable:$false] %s568_s26 }
  0x3f   : > { %s570_s8 = scalar_lea.vmem %s569_s26, 256  ;;  %p571_p3 = scmp.lt.s32.totalorder %s788_s28, %s569_s26 }
  0x40   : > { %p566_p10 = pnand %p564_p8, %p550_p0  ;;  %p572_p7 = scmp.lt.s32.totalorder %s570_s8, %s563_s5 }
  0x42   : > { %p567_p13 = pneg %p566_p10  ;;  %p573_p9 = por %p572_p7, %p571_p3 }
  0x44   : > { %p574_p2 = pnand %p573_p9, %p567_p13 }
  0x46   : > { %577 = shalt.err (!%p574_p2)
}
  0x47   : > { %468 = dma.hbm_to_vmem [thread:$0]  (!%p784_p11), %s782_s9, 128, %s788_s28, %s174_s10  }
  0x48   : > { %p907_p5 = scmp.ne.s32.totalorder %s902_s23, 0 }
  0x49   : > { %s818_s25 = sand.u32 (!%p907_p5), 1, %s640_s16   ;;  %p908_p0 = scmp.ne.s32.totalorder (!%p907_p5), %s900_s21, 0 }
  0x4a   : > { %193 = sbr.rel (%p907_p5) target bundleno = 644 (0x284), region = 36  ;;  %s430_s11 = sshll.u32 (!%p907_p5), %s818_s25, 3 }
  0x4b   : > { %s196_s12 = scalar_lea.sflag (!%p907_p5), [#allocation3], %s818_s25  ;;  %s199_s13 = scalar_lea.vmem (!%p907_p5), [#allocation2], %s430_s11 }
  0x51   : > { %623 = dma.done.wait (%p908_p0), %s196_s12, 128  }
  0x52   : > { %625 = vsyncadd (%p908_p0), %s196_s12, 4294967168  ;;  %p909_p11 = scmp.eq.s32.totalorder %s703_s19, 0 }
  0x54   : > { %627 = dma.done.wait (%p909_p11), [#allocation6], 256   ;;  %p910_p1 = pmov %p909_p11 }
  0x55   : > { %vm230_vm0 = vcmask 261120   ;;  %v229_v0 = vld [vmem:[%s199_s13] sm:$0xff]  ;;  %v514_v7 = vld [vmem:[#allocation5] sm:$0xff]   ;;  %v654_v8 = vmov 0.0   ;;  %vm655_vm1 = vmmov 0   ;;  %v515_v9 = vld [vmem:[#allocation5 + $0x8] sm:$0xff]  }
  0x56   : > { %629 = vsyncadd (%p910_p1), [#allocation6], 4294967040  ;;  %v231_v1 = vsel %vm230_vm0, %v229_v0, 0.0  ;;  %445 = vmatprep.subr.bf16.mxu0 %v654_v8  ;;  %449 = vmatprep.mubr.msk.bf16.mxu0 %vm655_vm1, %v654_v8  ;;  %v433_v19 = vld [vmem:[%s893_s1] ss:$0 sm:$0xff]  ;;  %s439_s29 = sshll.u32 %s703_s19, 7 }
  0x57   : > { %232 = vadd.xlane.f32.xlu0 %v231_v1  ;;  %446 = vmatpush3.bf16.msra.mxu0 %v514_v7  ;;  %v434_v21 = vld [vmem:[%s894_s2] ss:$0 sm:$0xff]  ;;  %s227_s10 = scalar_lea.vmem [#allocation7], %s430_s11  ;;  %s847_s5 = scalar_lea.hbm %s896_s4, %s439_s29 }
  0x58   : > { %447 = vmatprep.subr.bf16.mxu0 %v654_v8  ;;  %s343_s14 = sshll.u32 %s227_s10, 4  ;;  %s330_s19 = scalar_lea.sflag [#allocation4], %s818_s25  ;;  %s849_s14 = int_to_ptr.vmem [resolvable:$true] %s343_s14 }
  0x59   : > { %s578_s7 = scalar_lea.vmem %s849_s14, 128  ;;  %s656_s26 = smov [#allocation7]  }
  0x5a   : > { %p579_p4 = scmp.ne.s32.totalorder %s849_s14, %s578_s7  ;;  %s582_s8 = sshll.u32 %s656_s26, 4  ;;  %s583_s8 = int_to_ptr.vmem [resolvable:$false] %s582_s8 }
  0x5b   : > { %448 = vmatpush3.bf16.msra.mxu0 %v515_v9  ;;  %s584_s11 = scalar_lea.vmem %s583_s8, 256  ;;  %p585_p10 = scmp.lt.s32.totalorder %s849_s14, %s583_s8 }
  0x5c   : > { %p580_p6 = pnand %p579_p4, %p773_p12  ;;  %p586_p13 = scmp.lt.s32.totalorder %s584_s11, %s578_s7 }
  0x5e   : > { %p581_p8 = pneg %p580_p6  ;;  %p587_p3 = por %p586_p13, %p585_p10 }
  0x60   : > { %p588_p7 = pnand %p587_p3, %p581_p8 }
  0xe4   : > { %v233_v2 = vpop.xlane.xlu0 %232 }
  0xe5   : > { %v234_v3 = vmul.f32 0.03125, %v233_v2 }
  0xe7   : > { %v235_v4 = vsub.f32 %v229_v0, %v234_v3 }
  0xe9   : > { %v236_v5 = vmul.f32 %v235_v4, %v235_v4 }
  0xeb   : > { %v237_v6 = vsel %vm230_vm0, %v236_v5, 0.0 }
  0xec   : > { %238 = vadd.xlane.f32.xlu0 %v237_v6 }
 0x179   : > { %v239_v10 = vpop.xlane.xlu0 %238 }
 0x17a   : > { %v240_v11 = vmul.f32 0.032258064, %v239_v10 }
 0x17c   : > { %516 = vrsqrt.f32 %v240_v11  ;;  %vm243_vm2 = vcmp.eq.f32.partialorder %v240_v11, inf  ;;  %v246_v14 = vand.u32 2147483648, %v240_v11  ;;  %vm245_vm3 = vcmp.eq.f32.partialorder %v240_v11, 0.0 }
 0x186   : > { %v517_v12 = vpop.eup %516 }
 0x187   : > { %v242_v13 = vmul.f32 %v517_v12, %v240_v11 }
 0x189   : > { %v244_v15 = vsel %vm243_vm2, %v240_v11, %v242_v13 }
 0x18a   : > { %v247_v16 = vsel %vm245_vm3, %v246_v14, %v244_v15 }
 0x18b   : > { %v248_v17 = vadd.f32 1e-06, %v247_v16 }
 0x18d   : > { %518 = vrcp.f32 %v248_v17 }
 0x197   : > { %v519_v18 = vpop.eup %518 }
 0x198   : > { %v252_v20 = vmul.f32 %v519_v18, %v235_v4 }
 0x19a   : > { %v259_v22 = vmul.f32 %v433_v19, %v252_v20 }
 0x19c   : > { %v266_v23 = vadd.f32 %v434_v21, %v259_v22 }
 0x19e   : > { %v267_v24 = vpack.c.bf16 %v266_v23, %v266_v23 }
 0x1a0   : > { %450 = vmatmul.mubr.msk.bf16.vlgmr.msra.gmra.mrb[0].mxu0 %vm230_vm0, %v267_v24 }
 0x273   : > { %v321_v25 = vpop.f32.mrb[0].mxu0 }
 0x274   : > { %v327_v26 = vadd.f32 %v321_v25, %v229_v0  ;;  %v451_v27 = vpop.f32.mrb[1].mxu0 }
 0x275   : > { %v324_v28 = vpop.f32.mrb[2].mxu0 }
 0x276   : > { %v452_v29 = vpop.f32.mrb[3].mxu0  ;;  %328 = vst.msk [vmem:[%s227_s10] sm:$0xff] %vm230_vm0, %v327_v26 }
 0x277   : > { %591 = shalt.err (!%p588_p7)
}
 0x278   : > { %s592_s25 = scalar_lea.hbm %s847_s5, 128  ;;  %s596_s21 = scalar_lea.hbm %s896_s4, 256 }
 0x279   : > { %p593_p9 = scmp.ne.s32.totalorder %s847_s5, %s592_s25  ;;  %p597_p0 = scmp.lt.u32.totalorder %s847_s5, %s896_s4 }
 0x27a   : > { %p598_p11 = scmp.lt.u32.totalorder %s596_s21, %s592_s25  ;;  %p600_p4 = scmp.lt.u32.totalorder %s592_s25, %s847_s5 }
 0x27b   : > { %p594_p2 = pnand %p593_p9, %p773_p12 }
 0x27c   : > { %p599_p1 = por %p598_p11, %p597_p0 }
 0x27d   : > { %p595_p5 = pneg %p594_p2 }
 0x27e   : > { %p601_p6 = por %p600_p4, %p599_p1 }
 0x280   : > { %p602_p8 = pnand %p601_p6, %p595_p5 }
 0x282   : > { %605 = shalt.err (!%p602_p8)
}
 0x283   : > { %459 = dma.vmem_to_hbm [thread:$0]  (%p773_p12), %s849_s14, 128, %s847_s5, %s330_s19  }
 0x284 PF: > { %s355_s28 = sand.u32 1, %s636_s15   ;;  %p911_p10 = scmp.ne.s32.totalorder %s901_s22, 0 }
 0x285   : > { %p912_p13 = scmp.ge.s32.totalorder %s648_s18, 2  ;;  %s356_s29 = scalar_lea.sflag [#allocation4], %s355_s28 }
 0x287   : > { %p470_p3 = pnand %p912_p13, %p911_p10 }
 0x289   : > { %631 = dma.done.wait (!%p470_p3), %s356_s29, 128  }
 0x28a   : > { %633 = vsyncadd (!%p470_p3), %s356_s29, 4294967168  ;;  %p18_p7 = scmp.ge.s32.totalorder %s738_s27, 4   ;;  %s913_s15 = smov %s640_s16 }
 0x28b   : > { %s914_s16 = smov %s644_s17  ;;  %s915_s17 = smov %s769_s24 }
 0x28c   : > { %s916_s18 = smov %s738_s27  ;;  %20 = sbr.rel (!%p18_p7) target bundleno = 6 (0x6), region = 85 }
 0x293   :  { %361 = vsyncpa [#allocation3], 1 }
 0x294   :  { %363 = vsyncpa [#allocation3 + $0x1], 1 }
 0x295   :  { %364 = vsyncpa [#allocation6], 1 }
 0x296   :  { %365 = vsyncpa [#allocation4], 1 }
 0x297   :  { %367 = vsyncpa [#allocation4 + $0x1], 1 }

</bundles_post_ra>
